<compile_context>
chip_gen: v6e
topology: v6e:2x2x1
jax: 0.10.0
libtpu: 0.0.40
codegen_flags: <defaults>
</compile_context>

<pallas_src>
import jax
import jax.numpy as jnp
from jax.experimental import pallas as pl
from jax.experimental.pallas import tpu as pltpu


def _round_up(a, b):
    return ((a + b - 1) // b) * b


def tcl_kernel(up_ref, x_ref, o_ref):
    # up_ref: (1,) f32 parameter in SMEM.
    x = x_ref[...]
    # Compute in the native floating dtype (bf16 stays bf16 on v6e/v7x);
    # only non-float inputs are widened to f32.
    cdt = x.dtype if jnp.issubdtype(x.dtype, jnp.floating) else jnp.float32
    up = up_ref[0].astype(cdt)
    y = jnp.minimum(jnp.maximum(x.astype(cdt), 0), up)   # clamp(x, 0, up)
    o_ref[...] = y.astype(o_ref.dtype)


def _choose_lane_width(total):
    """Largest lane-dense last dim L (multiple of 128) dividing `total`,
    preferring one that still leaves >= 8 rows."""
    for cand in (2048, 1024, 512, 256, 128):
        if total % cand == 0 and total // cand >= 8:
            return cand
    for cand in (2048, 1024, 512, 256, 128):
        if total % cand == 0:
            return cand
    raise ValueError("total must be a multiple of 128 here")


def _tile_rows(M, L, itemsize):
    """Row-tile size: >= ~1 MiB (roofline plateau), <= ~4 MiB (VMEM budget),
    aiming for >= 8 grid steps (>= 4 per TensorCore on v7x)."""
    row_quantum = 8 * max(1, 4 // itemsize)        # 8 rows f32, 16 bf16, 32 int8
    if M <= row_quantum:
        return M
    row_bytes = L * itemsize
    min_rows = _round_up(max(1, pl.cdiv(1 << 20, row_bytes)), row_quantum)
    max_rows = max(row_quantum,
                   ((4 << 20) // row_bytes // row_quantum) * row_quantum)
    step_rows = _round_up(pl.cdiv(M, 8), row_quantum)      # -> >= ~8 grid steps
    tm = min(max_rows, max(min_rows, step_rows))
    if tm >= M:
        tm = M                                              # single full block
    return tm


def _tcl_flat(xf, up):
    """Kernel launch on a flat array whose size is a multiple of 128."""
    total = int(xf.size)
    dtype = xf.dtype
    itemsize = jnp.dtype(dtype).itemsize

    L = _choose_lane_width(total)
    M = total // L
    x2d = xf.reshape(M, L)

    tm = _tile_rows(M, L, itemsize)
    grid = (pl.cdiv(M, tm),)

    out2d = pl.pallas_call(
        tcl_kernel,
        out_shape=jax.ShapeDtypeStruct((M, L), dtype),
        grid=grid,
        in_specs=[
            pl.BlockSpec(memory_space=pltpu.MemorySpace.SMEM),   # up (scalar)
            pl.BlockSpec((tm, L), lambda i: (i, 0)),             # x tile
        ],
        out_specs=pl.BlockSpec((tm, L), lambda i: (i, 0)),
        compiler_params=pltpu.CompilerParams(
            dimension_semantics=("parallel",),
            vmem_limit_bytes=32 * 1024 * 1024,
        ),
        cost_estimate=pl.CostEstimate(
            flops=2 * total,
            transcendentals=0,
            bytes_accessed=2 * total * itemsize,
        ),
    )(up, x2d)
    return out2d.reshape(-1)


def tcl_forward(x, up):
    """x: arbitrary-shape tensor (e.g. NCHW).  up: (1,) float32 parameter."""
    orig_shape = x.shape
    dtype = x.dtype
    total = int(x.size)
    up = jnp.asarray(up, jnp.float32).reshape(1)

    if total == 0:
        return x

    if total % 128 == 0:
        return _tcl_flat(x.reshape(-1), up).reshape(orig_shape)

    # Ragged size: kernel over the largest 128-aligned prefix; clamp the
    # (<128 element) tail with a tiny jnp op.  No full-array pad/slice passes.
    xf = x.reshape(-1)
    split = (total // 128) * 128
    tail = jnp.minimum(jnp.maximum(xf[split:].astype(jnp.float32), 0.0),
                       up[0]).astype(dtype)
    if split == 0:
        return tail.reshape(orig_shape)
    head = _tcl_flat(xf[:split], up)
    return jnp.concatenate([head, tail]).reshape(orig_shape)


def tcl_reference(x, up):
    """Pure-JAX reference mirroring the PyTorch forward literally."""
    xf = jnp.maximum(x.astype(jnp.float32), 0.0)
    xf = up[0] - xf
    xf = jnp.maximum(xf, 0.0)
    xf = up[0] - xf
    return xf.astype(x.dtype)


if __name__ == "__main__":
    key = jax.random.PRNGKey(0)
    # Small NCHW input consistent with the CIFAR-style module usage.
    x = jax.random.normal(key, (2, 4, 16, 16), dtype=jnp.float32) * 6.0
    # Deterministic parameter init: matches nn.Parameter(torch.Tensor([8.0])).
    up = jnp.array([8.0], dtype=jnp.float32)

    out = tcl_forward(x, up)
    out = jax.block_until_ready(out)

    ref = tcl_reference(x, up)
    assert out.shape == x.shape and out.dtype == x.dtype
    # clamp form differs from the literal relu/sub chain by at most 1 ulp(up).
    assert jnp.allclose(out, ref, atol=1e-5, rtol=1e-5), "mismatch vs reference"

    print("KERNEL_OK")
</pallas_src>

<mosaic_0001>
module attributes {stable_mosaic.version = 11 : i64} {
  func.func @tcl_kernel(%arg0: i32, %arg1: memref<1xf32, #tpu.memory_space<smem>>, %arg2: memref<8x256xf32, #tpu.memory_space<vmem>>, %arg3: memref<8x256xf32, #tpu.memory_space<vmem>>) attributes {dimension_semantics = [#tpu.dimension_semantics<parallel>], iteration_bounds = array<i64: 1>, scalar_prefetch = 0 : i64, scratch_operands = 0 : i64, tpu.core_type = #tpu.core_type<tc>, window_params = [{transform_indices = @transform_0, window_bounds = array<i64: 1>}, {transform_indices = @transform_1, window_bounds = array<i64: 8, 256>}, {transform_indices = @transform_2, window_bounds = array<i64: 8, 256>}]} {
    %c0 = arith.constant 0 : index
    %c0_0 = arith.constant 0 : index
    %0 = vector.load %arg2[%c0, %c0_0] : memref<8x256xf32, #tpu.memory_space<vmem>>, vector<8x256xf32>
    %c0_1 = arith.constant 0 : index
    %1 = memref.load %arg1[%c0_1] : memref<1xf32, #tpu.memory_space<smem>>
    %cst = arith.constant 0.000000e+00 : f32
    %2 = vector.broadcast %cst : f32 to vector<8x256xf32>
    %3 = arith.maximumf %0, %2 : vector<8x256xf32>
    %4 = vector.broadcast %1 : f32 to vector<8x256xf32>
    %5 = arith.minimumf %3, %4 : vector<8x256xf32>
    %c0_2 = arith.constant 0 : index
    %c0_3 = arith.constant 0 : index
    %6 = vector.load %arg3[%c0_2, %c0_3] : memref<8x256xf32, #tpu.memory_space<vmem>>, vector<8x256xf32>
    tpu.vector_store %arg3[%c0_2, %c0_3], %5 {strides = array<i32>} : memref<8x256xf32, #tpu.memory_space<vmem>>, vector<8x256xf32>,
    return
  }
  func.func @transform_0(%arg0: i32) -> i32 {
    %c0_i32 = arith.constant 0 : i32
    %c0_i32_0 = arith.constant 0 : i32
    return %c0_i32 : i32
  }
  func.func @transform_1(%arg0: i32) -> (i32, i32) {
    %c0_i32 = arith.constant 0 : i32
    %c0_i32_0 = arith.constant 0 : i32
    return %arg0, %c0_i32 : i32, i32
  }
  func.func @transform_2(%arg0: i32) -> (i32, i32) {
    %c0_i32 = arith.constant 0 : i32
    %c0_i32_0 = arith.constant 0 : i32
    return %arg0, %c0_i32 : i32, i32
  }
}

</mosaic_0001>

<bundles_post_ra>
// kernel: tpu_custom_call.1
= control target key start
LH: loop header
LB: loop body
LE: loop exit
PB: predicated region body
PF: predicated region fallthrough
CT: control target
= control target key end

     0   :  { %8 = vsyncpa [#allocation4], 0  ;;  %s122_s0 = inlined_call_operand.<no memory space> [shape: f32[1], index: 0, kind: input, shape index: {}]   ;;  %s123_s1 = inlined_call_operand.hbm [shape: f32[8,256], index: 1, kind: input, shape index: {}]   ;;  %s124_s2 = inlined_call_operand.hbm [shape: f32[8,256], index: 2, kind: output, shape index: {}]  }
   0x1   :  { %9 = vsyncpa [#allocation5], 0  ;;  %s96_s9 = smov [#allocation3]  }
   0x2   :  { %s18_s10 = sshll.u32 %s96_s9, 4  ;;  %s19_s10 = int_to_ptr.vmem [resolvable:$true] %s18_s10 }
   0x3   :  { %s60_s11 = scalar_lea.vmem %s19_s10, 256  ;;  %p65_p1 = scmp.lt.s32.totalorder %s19_s10, %s19_s10 }
   0x4   :  { %p61_p0 = scmp.ne.s32.totalorder %s19_s10, %s60_s11  ;;  %p66_p2 = scmp.lt.s32.totalorder %s60_s11, %s60_s11 }
   0x6   :  { %p67_p3 = por %p66_p2, %p65_p1 }
   0x8   :  { %p68_p4 = pnand %p67_p3, %p61_p0 }
   0xa   :  { %71 = shalt.err (!%p68_p4)
}
   0xb   :  { %21 = dma.hbm_to_vmem [thread:$0]  %s123_s1, 256, %s19_s10, [#allocation4]  }
   0xc   :  { %92 = dma.done.wait [#allocation4], 256  }
   0xd   :  { %93 = vsyncadd [#allocation4], 4294967040  ;;  %v25_v0 = vld [vmem:[#allocation3] sm:$0xff]  ;;  %v30_v1 = vstv %s122_s0  ;;  %v26_v2 = vld [vmem:[#allocation3 + $0x8] sm:$0xff]  ;;  %s97_s16 = smov [#allocation6]  }
   0xe   :  { %s41_s17 = sshll.u32 %s97_s16, 4  ;;  %v28_v3 = vmax.f32 %v25_v0, 0.0  ;;  %v29_v4 = vmax.f32 %v26_v2, 0.0  ;;  %s42_s17 = int_to_ptr.vmem [resolvable:$true] %s41_s17 }
   0xf   :  { %s72_s18 = scalar_lea.vmem %s42_s17, 256  ;;  %p77_p6 = scmp.lt.s32.totalorder %s42_s17, %s42_s17 }
  0x10   :  { %v31_v5 = vmin.f32 %v28_v3, %v30_v1  ;;  %v32_v6 = vmin.f32 %v29_v4, %v30_v1  ;;  %p73_p5 = scmp.ne.s32.totalorder %s42_s17, %s72_s18  ;;  %p78_p7 = scmp.lt.s32.totalorder %s72_s18, %s72_s18 }
  0x12   :  { %33 = vst [vmem:[#allocation6] sm:$0xff] %v31_v5  ;;  %34 = vst [vmem:[#allocation6 + $0x8] sm:$0xff] %v32_v6  ;;  %p79_p8 = por %p78_p7, %p77_p6 }
  0x14   :  { %p80_p9 = pnand %p79_p8, %p73_p5 }
  0x16   :  { %83 = shalt.err (!%p80_p9)
}
  0x17   :  { %44 = dma.vmem_to_hbm [thread:$0]  %s42_s17, 256, %s124_s2, [#allocation5]  }
  0x18   :  { %94 = dma.done.wait [#allocation5], 256  }
  0x19   :  { %95 = vsyncadd [#allocation5], 4294967040 }
  0x1a   :  { %48 = vsyncpa [#allocation4], 1 }
  0x1b   :  { %49 = vsyncpa [#allocation5], 1 }

</bundles_post_ra>
